<compile_context>
chip_gen: v6e
topology: v6e:2x2x1
jax: 0.10.0
libtpu: 0.0.40
codegen_flags: <defaults>
</compile_context>

<pallas_src>
import jax
import jax.numpy as jnp
from jax.experimental import pallas as pl
from jax.experimental.pallas import tpu as pltpu

_OUT_PAD = 8     # stored classifier-head width (real out_features = 2)
_LANES = 128


def _round_up(x, m):
    return ((x + m - 1) // m) * m


def _mlp_kernel(num_ref, cat_ref, twt_ref, des_ref,
                wbn_ref, wbc_ref, wbt_ref, wbd_ref,
                b_in_ref, w1_ref, b1_ref, w2_ref, b2_ref,
                out_ref):
    """One batch tile: 6 MXU pushes + f32 bias/ReLU epilogues."""
    dt = w1_ref.dtype  # matmul dtype (bf16 in deployment, f32 for exact check)

    # Branch projections. Each wb*_ref is a row-slab of the block-diagonal
    # fused branch weight (nonzero only in its hidden/4 column block), so the
    # sum of the four dots equals the concat of the four branch outputs.
    # Inputs are cast to the matmul dtype HERE (not in the wrapper) so HBM
    # only carries the caller's f32 once.
    h = jnp.dot(num_ref[...].astype(dt), wbn_ref[...],
                preferred_element_type=jnp.float32)
    h = h + jnp.dot(cat_ref[...].astype(dt), wbc_ref[...],
                    preferred_element_type=jnp.float32)
    h = h + jnp.dot(twt_ref[...].astype(dt), wbt_ref[...],
                    preferred_element_type=jnp.float32)
    h = h + jnp.dot(des_ref[...].astype(dt), wbd_ref[...],
                    preferred_element_type=jnp.float32)
    h = jnp.maximum(h + b_in_ref[...], 0.0)            # f32 epilogue

    # lin1 + ReLU (single K=hidden matmul, f32 accumulate).
    f = jnp.dot(h.astype(dt), w1_ref[...], preferred_element_type=jnp.float32)
    f = jnp.maximum(f + b1_ref[...], 0.0)

    # lin2 head, padded to _OUT_PAD lanes; the (tb, 8) store is contiguous in HBM.
    out_ref[...] = (
        jnp.dot(f.astype(dt), w2_ref[...], preferred_element_type=jnp.float32)
        + b2_ref[...]
    )
    # TODO(synk): dropout (training mode) omitted -- eval-mode forward only.


def init_params(key, numeric_num, cat_num, tweet_dim, des_dim, hidden_size):
    """Per-layer params matching the PyTorch module (weights stored (in, out))."""
    q = hidden_size // 4
    keys = jax.random.split(key, 12)

    def lin(kw, kb, fan_in, fan_out):
        bound = 1.0 / jnp.sqrt(fan_in)
        w = jax.random.uniform(kw, (fan_in, fan_out), jnp.float32, -bound, bound)
        b = jax.random.uniform(kb, (1, fan_out), jnp.float32, -bound, bound)
        return w, b

    wn, bn = lin(keys[0], keys[1], numeric_num, q)
    wc, bc = lin(keys[2], keys[3], cat_num, q)
    wt, bt = lin(keys[4], keys[5], tweet_dim, q)
    wd, bd = lin(keys[6], keys[7], des_dim, q)
    w1, b1 = lin(keys[8], keys[9], hidden_size, hidden_size)
    w2, b2 = lin(keys[10], keys[11], hidden_size, 2)
    return dict(wn=wn, bn=bn, wc=wc, bc=bc, wt=wt, bt=bt, wd=wd, bd=bd,
                w1=w1, b1=b1, w2=w2, b2=b2)


def fuse_params(params, *, matmul_dtype=jnp.bfloat16):
    """One-time wrapper-side fusion.

    Branch weights become 4 row-slabs of the block-diagonal (f_in, hidden)
    weight (assembled here so the kernel never does packed-dtype sublane
    slicing); the head is padded to _OUT_PAD output lanes.  bf16 matmul dtype
    by default (3x MXU throughput, half the weight bytes); biases and all
    elementwise epilogues stay f32.
    """
    wn, wc, wt, wd = params["wn"], params["wc"], params["wt"], params["wd"]
    q = wn.shape[1]
    hidden = 4 * q

    def slab(w, k):
        s = jnp.zeros((w.shape[0], hidden), jnp.float32)
        return s.at[:, k * q:(k + 1) * q].set(w).astype(matmul_dtype)

    w_br = tuple(slab(w, k) for k, w in enumerate((wn, wc, wt, wd)))
    b_in = jnp.concatenate(
        [params["bn"], params["bc"], params["bt"], params["bd"]], axis=-1)

    w2, b2 = params["w2"], params["b2"]
    out_dim = w2.shape[1]
    w2p = (jnp.zeros((hidden, _OUT_PAD), jnp.float32)
           .at[:, :out_dim].set(w2).astype(matmul_dtype))
    b2p = jnp.zeros((1, _OUT_PAD), jnp.float32).at[:, :out_dim].set(b2)

    return dict(w_br=w_br, b_in=b_in,
                w1=params["w1"].astype(matmul_dtype), b1=params["b1"],
                w2=w2p, b2=b2p, out_dim=out_dim)


def mlp_forward(numeric, cat, tweet, des, fused, *, block_b=2048):
    """Pallas forward pass (eval mode). Inputs are (B, d_i) f32 arrays."""
    B = numeric.shape[0]
    hidden = fused["w1"].shape[0]
    out_dim = fused["out_dim"]

    # ---- batch tiling -----------------------------------------------------
    # Lane-padded VMEM working set per row: 4 double-buffered inputs + 1
    # double-buffered output (all pad to 128 lanes in VMEM) + ~3 hidden-wide
    # f32 intermediates.  Cap tb so this stays under ~40 MiB (v7x: 64 MiB
    # physical / 32 MiB scoped default; v5e/v6e have 128 MiB physical).
    per_row_bytes = ((4 * 2 + 2) * _LANES + 3 * hidden) * 4
    max_tb = max(8, ((40 << 20) // per_row_bytes) // 8 * 8)
    block_b = min(block_b, max_tb)

    # >= 2 (even) grid steps when the batch allows so the "parallel" axis is
    # split across both v7x TensorCores; tile is a multiple of 8 sublanes and
    # (nearly) divides B so padding stays below one tile.
    steps = max(2 if B > 8 else 1, pl.cdiv(B, block_b))
    if steps > 1 and steps % 2 == 1:
        steps += 1
    tb = _round_up(pl.cdiv(B, steps), 8)
    b_pad = steps * tb

    inputs = [numeric, cat, tweet, des]
    if b_pad != B:  # only the 4 narrow inputs are padded (no concat pass)
        inputs = [jnp.pad(x, ((0, b_pad - B), (0, 0))) for x in inputs]

    weights = (*fused["w_br"], fused["b_in"], fused["w1"], fused["b1"],
               fused["w2"], fused["b2"])

    def batch_spec(d):
        return pl.BlockSpec((tb, d), lambda i: (i, 0))

    def resident(arr):  # weights/biases stay VMEM-resident across batch tiles
        return pl.BlockSpec(arr.shape, lambda i: (0, 0))

    in_specs = ([batch_spec(x.shape[1]) for x in inputs]
                + [resident(w) for w in weights])
    out_specs = pl.BlockSpec((tb, _OUT_PAD), lambda i: (i, 0))

    vmem_limit = int(min(max(tb * per_row_bytes * 13 // 10, 32 << 20), 48 << 20))

    out = pl.pallas_call(
        _mlp_kernel,
        out_shape=jax.ShapeDtypeStruct((b_pad, _OUT_PAD), jnp.float32),
        grid_spec=pl.GridSpec(grid=(steps,), in_specs=in_specs,
                              out_specs=out_specs),
        compiler_params=pltpu.CompilerParams(
            dimension_semantics=("parallel",),
            vmem_limit_bytes=vmem_limit,
        ),
    )(*inputs, *weights)

    return out[:B, :out_dim]


def _reference(numeric, cat, tweet, des, p):
    relu = lambda v: jnp.maximum(v, 0.0)
    hn = relu(numeric @ p["wn"] + p["bn"])
    hc = relu(cat @ p["wc"] + p["bc"])
    ht = relu(tweet @ p["wt"] + p["bt"])
    hd = relu(des @ p["wd"] + p["bd"])
    feat = jnp.concatenate([hn, hc, ht, hd], axis=-1)
    f = relu(feat @ p["w1"] + p["b1"])
    return f @ p["w2"] + p["b2"]


if __name__ == "__main__":
    numeric_num, cat_num, tweet_dim, des_dim = 5, 3, 16, 12
    hidden_size = 128   # small, divisible by 4
    batch = 8

    key = jax.random.PRNGKey(0)
    kp, kn, kc, kt, kd = jax.random.split(key, 5)
    params = init_params(kp, numeric_num, cat_num, tweet_dim, des_dim, hidden_size)

    numeric = jax.random.normal(kn, (batch, numeric_num), jnp.float32)
    cat = jax.random.normal(kc, (batch, cat_num), jnp.float32)
    tweet = jax.random.normal(kt, (batch, tweet_dim), jnp.float32)
    des = jax.random.normal(kd, (batch, des_dim), jnp.float32)

    ref = _reference(numeric, cat, tweet, des, params)

    # Deployment path: bf16 MXU weights (cheaper HBM/VMEM, bf16-native MXU).
    fused_bf16 = fuse_params(params)  # matmul_dtype=jnp.bfloat16 by default
    out_bf16 = jax.block_until_ready(mlp_forward(numeric, cat, tweet, des, fused_bf16))
    assert out_bf16.shape == (batch, 2)
    assert jnp.allclose(out_bf16, ref, atol=5e-2, rtol=5e-2)

    # f32 MXU path: tight check against the pure-JAX reference.
    fused_f32 = fuse_params(params, matmul_dtype=jnp.float32)
    out_f32 = jax.block_until_ready(mlp_forward(numeric, cat, tweet, des, fused_f32))
    assert out_f32.shape == (batch, 2)
    assert jnp.allclose(out_f32, ref, atol=1e-3, rtol=1e-3)

    print("KERNEL_OK")
</pallas_src>

<mosaic_0001>
module attributes {stable_mosaic.version = 11 : i64} {
  func.func @_mlp_kernel(%arg0: i32, %arg1: memref<8x5xf32, #tpu.memory_space<vmem>>, %arg2: memref<8x3xf32, #tpu.memory_space<vmem>>, %arg3: memref<8x16xf32, #tpu.memory_space<vmem>>, %arg4: memref<8x12xf32, #tpu.memory_space<vmem>>, %arg5: memref<5x128xbf16, #tpu.memory_space<vmem>>, %arg6: memref<3x128xbf16, #tpu.memory_space<vmem>>, %arg7: memref<16x128xbf16, #tpu.memory_space<vmem>>, %arg8: memref<12x128xbf16, #tpu.memory_space<vmem>>, %arg9: memref<1x128xf32, #tpu.memory_space<vmem>>, %arg10: memref<128x128xbf16, #tpu.memory_space<vmem>>, %arg11: memref<1x128xf32, #tpu.memory_space<vmem>>, %arg12: memref<128x8xbf16, #tpu.memory_space<vmem>>, %arg13: memref<1x8xf32, #tpu.memory_space<vmem>>, %arg14: memref<8x8xf32, #tpu.memory_space<vmem>>) attributes {dimension_semantics = [#tpu.dimension_semantics<parallel>], iteration_bounds = array<i64: 1>, scalar_prefetch = 0 : i64, scratch_operands = 0 : i64, tpu.core_type = #tpu.core_type<tc>, window_params = [{transform_indices = @transform_0, window_bounds = array<i64: 8, 5>}, {transform_indices = @transform_1, window_bounds = array<i64: 8, 3>}, {transform_indices = @transform_2, window_bounds = array<i64: 8, 16>}, {transform_indices = @transform_3, window_bounds = array<i64: 8, 12>}, {pipeline_mode = #tpu.pipeline_mode<synchronous>, transform_indices = @transform_4, window_bounds = array<i64: 5, 128>}, {pipeline_mode = #tpu.pipeline_mode<synchronous>, transform_indices = @transform_5, window_bounds = array<i64: 3, 128>}, {pipeline_mode = #tpu.pipeline_mode<synchronous>, transform_indices = @transform_6, window_bounds = array<i64: 16, 128>}, {pipeline_mode = #tpu.pipeline_mode<synchronous>, transform_indices = @transform_7, window_bounds = array<i64: 12, 128>}, {pipeline_mode = #tpu.pipeline_mode<synchronous>, transform_indices = @transform_8, window_bounds = array<i64: 1, 128>}, {pipeline_mode = #tpu.pipeline_mode<synchronous>, transform_indices = @transform_9, window_bounds = array<i64: 128, 128>}, {pipeline_mode = #tpu.pipeline_mode<synchronous>, transform_indices = @transform_10, window_bounds = array<i64: 1, 128>}, {pipeline_mode = #tpu.pipeline_mode<synchronous>, transform_indices = @transform_11, window_bounds = array<i64: 128, 8>}, {pipeline_mode = #tpu.pipeline_mode<synchronous>, transform_indices = @transform_12, window_bounds = array<i64: 1, 8>}, {transform_indices = @transform_13, window_bounds = array<i64: 8, 8>}]} {
    %c0 = arith.constant 0 : index
    %c0_0 = arith.constant 0 : index
    %0 = vector.load %arg1[%c0, %c0_0] : memref<8x5xf32, #tpu.memory_space<vmem>>, vector<8x5xf32>
    %1 = arith.truncf %0 : vector<8x5xf32> to vector<8x5xbf16>
    %c0_1 = arith.constant 0 : index
    %c0_2 = arith.constant 0 : index
    %2 = vector.load %arg5[%c0_1, %c0_2] : memref<5x128xbf16, #tpu.memory_space<vmem>>, vector<5x128xbf16>
    %cst = arith.constant dense<0.000000e+00> : vector<8x128xf32>
    %3 = tpu.matmul %1, %2, %cst {dimension_numbers = #tpu.dot_dimension_numbers<[1], [0], [0], [1], [0, 0, 1, 1], [], []>} : vector<8x5xbf16>, vector<5x128xbf16>, vector<8x128xf32> -> vector<8x128xf32>
    %c0_3 = arith.constant 0 : index
    %c0_4 = arith.constant 0 : index
    %4 = vector.load %arg2[%c0_3, %c0_4] : memref<8x3xf32, #tpu.memory_space<vmem>>, vector<8x3xf32>
    %5 = arith.truncf %4 : vector<8x3xf32> to vector<8x3xbf16>
    %c0_5 = arith.constant 0 : index
    %c0_6 = arith.constant 0 : index
    %6 = vector.load %arg6[%c0_5, %c0_6] : memref<3x128xbf16, #tpu.memory_space<vmem>>, vector<3x128xbf16>
    %cst_7 = arith.constant dense<0.000000e+00> : vector<8x128xf32>
    %7 = tpu.matmul %5, %6, %cst_7 {dimension_numbers = #tpu.dot_dimension_numbers<[1], [0], [0], [1], [0, 0, 1, 1], [], []>} : vector<8x3xbf16>, vector<3x128xbf16>, vector<8x128xf32> -> vector<8x128xf32>
    %8 = arith.addf %3, %7 : vector<8x128xf32>
    %c0_8 = arith.constant 0 : index
    %c0_9 = arith.constant 0 : index
    %9 = vector.load %arg3[%c0_8, %c0_9] : memref<8x16xf32, #tpu.memory_space<vmem>>, vector<8x16xf32>
    %10 = arith.truncf %9 : vector<8x16xf32> to vector<8x16xbf16>
    %c0_10 = arith.constant 0 : index
    %c0_11 = arith.constant 0 : index
    %11 = vector.load %arg7[%c0_10, %c0_11] : memref<16x128xbf16, #tpu.memory_space<vmem>>, vector<16x128xbf16>
    %cst_12 = arith.constant dense<0.000000e+00> : vector<8x128xf32>
    %12 = tpu.matmul %10, %11, %cst_12 {dimension_numbers = #tpu.dot_dimension_numbers<[1], [0], [0], [1], [0, 0, 1, 1], [], []>} : vector<8x16xbf16>, vector<16x128xbf16>, vector<8x128xf32> -> vector<8x128xf32>
    %13 = arith.addf %8, %12 : vector<8x128xf32>
    %c0_13 = arith.constant 0 : index
    %c0_14 = arith.constant 0 : index
    %14 = vector.load %arg4[%c0_13, %c0_14] : memref<8x12xf32, #tpu.memory_space<vmem>>, vector<8x12xf32>
    %15 = arith.truncf %14 : vector<8x12xf32> to vector<8x12xbf16>
    %c0_15 = arith.constant 0 : index
    %c0_16 = arith.constant 0 : index
    %16 = vector.load %arg8[%c0_15, %c0_16] : memref<12x128xbf16, #tpu.memory_space<vmem>>, vector<12x128xbf16>
    %cst_17 = arith.constant dense<0.000000e+00> : vector<8x128xf32>
    %17 = tpu.matmul %15, %16, %cst_17 {dimension_numbers = #tpu.dot_dimension_numbers<[1], [0], [0], [1], [0, 0, 1, 1], [], []>} : vector<8x12xbf16>, vector<12x128xbf16>, vector<8x128xf32> -> vector<8x128xf32>
    %18 = arith.addf %13, %17 : vector<8x128xf32>
    %c0_18 = arith.constant 0 : index
    %c0_19 = arith.constant 0 : index
    %19 = vector.load %arg9[%c0_18, %c0_19] : memref<1x128xf32, #tpu.memory_space<vmem>>, vector<1x128xf32>
    %20 = vector.broadcast %19 : vector<1x128xf32> to vector<8x128xf32>
    %21 = arith.addf %18, %20 : vector<8x128xf32>
    %cst_20 = arith.constant 0.000000e+00 : f32
    %22 = vector.broadcast %cst_20 : f32 to vector<8x128xf32>
    %23 = arith.maximumf %21, %22 : vector<8x128xf32>
    %24 = arith.truncf %23 : vector<8x128xf32> to vector<8x128xbf16>
    %c0_21 = arith.constant 0 : index
    %c0_22 = arith.constant 0 : index
    %25 = vector.load %arg10[%c0_21, %c0_22] : memref<128x128xbf16, #tpu.memory_space<vmem>>, vector<128x128xbf16>
    %cst_23 = arith.constant dense<0.000000e+00> : vector<8x128xf32>
    %26 = tpu.matmul %24, %25, %cst_23 {dimension_numbers = #tpu.dot_dimension_numbers<[1], [0], [0], [1], [0, 0, 1, 1], [], []>} : vector<8x128xbf16>, vector<128x128xbf16>, vector<8x128xf32> -> vector<8x128xf32>
    %c0_24 = arith.constant 0 : index
    %c0_25 = arith.constant 0 : index
    %27 = vector.load %arg11[%c0_24, %c0_25] : memref<1x128xf32, #tpu.memory_space<vmem>>, vector<1x128xf32>
    %28 = vector.broadcast %27 : vector<1x128xf32> to vector<8x128xf32>
    %29 = arith.addf %26, %28 : vector<8x128xf32>
    %cst_26 = arith.constant 0.000000e+00 : f32
    %30 = vector.broadcast %cst_26 : f32 to vector<8x128xf32>
    %31 = arith.maximumf %29, %30 : vector<8x128xf32>
    %32 = arith.truncf %31 : vector<8x128xf32> to vector<8x128xbf16>
    %c0_27 = arith.constant 0 : index
    %c0_28 = arith.constant 0 : index
    %33 = vector.load %arg12[%c0_27, %c0_28] : memref<128x8xbf16, #tpu.memory_space<vmem>>, vector<128x8xbf16>
    %cst_29 = arith.constant dense<0.000000e+00> : vector<8x8xf32>
    %34 = tpu.matmul %32, %33, %cst_29 {dimension_numbers = #tpu.dot_dimension_numbers<[1], [0], [0], [1], [0, 0, 1, 1], [], []>} : vector<8x128xbf16>, vector<128x8xbf16>, vector<8x8xf32> -> vector<8x8xf32>
    %c0_30 = arith.constant 0 : index
    %c0_31 = arith.constant 0 : index
    %35 = vector.load %arg13[%c0_30, %c0_31] : memref<1x8xf32, #tpu.memory_space<vmem>>, vector<1x8xf32>
    %36 = vector.broadcast %35 : vector<1x8xf32> to vector<8x8xf32>
    %37 = arith.addf %34, %36 : vector<8x8xf32>
    %c0_32 = arith.constant 0 : index
    %c0_33 = arith.constant 0 : index
    %38 = vector.load %arg14[%c0_32, %c0_33] : memref<8x8xf32, #tpu.memory_space<vmem>>, vector<8x8xf32>
    tpu.vector_store %arg14[%c0_32, %c0_33], %37 {strides = array<i32>} : memref<8x8xf32, #tpu.memory_space<vmem>>, vector<8x8xf32>,
    return
  }
  func.func @transform_0(%arg0: i32) -> (i32, i32) {
    %c0_i32 = arith.constant 0 : i32
    %c0_i32_0 = arith.constant 0 : i32
    return %arg0, %c0_i32 : i32, i32
  }
  func.func @transform_1(%arg0: i32) -> (i32, i32) {
    %c0_i32 = arith.constant 0 : i32
    %c0_i32_0 = arith.constant 0 : i32
    return %arg0, %c0_i32 : i32, i32
  }
  func.func @transform_2(%arg0: i32) -> (i32, i32) {
    %c0_i32 = arith.constant 0 : i32
    %c0_i32_0 = arith.constant 0 : i32
    return %arg0, %c0_i32 : i32, i32
  }
  func.func @transform_3(%arg0: i32) -> (i32, i32) {
    %c0_i32 = arith.constant 0 : i32
    %c0_i32_0 = arith.constant 0 : i32
    return %arg0, %c0_i32 : i32, i32
  }
  func.func @transform_4(%arg0: i32) -> (i32, i32) {
    %c0_i32 = arith.constant 0 : i32
    %c0_i32_0 = arith.constant 0 : i32
    %c0_i32_1 = arith.constant 0 : i32
    return %c0_i32, %c0_i32_0 : i32, i32
  }
  func.func @transform_5(%arg0: i32) -> (i32, i32) {
    %c0_i32 = arith.constant 0 : i32
    %c0_i32_0 = arith.constant 0 : i32
    %c0_i32_1 = arith.constant 0 : i32
    return %c0_i32, %c0_i32_0 : i32, i32
  }
  func.func @transform_6(%arg0: i32) -> (i32, i32) {
    %c0_i32 = arith.constant 0 : i32
    %c0_i32_0 = arith.constant 0 : i32
    %c0_i32_1 = arith.constant 0 : i32
    return %c0_i32, %c0_i32_0 : i32, i32
  }
  func.func @transform_7(%arg0: i32) -> (i32, i32) {
    %c0_i32 = arith.constant 0 : i32
    %c0_i32_0 = arith.constant 0 : i32
    %c0_i32_1 = arith.constant 0 : i32
    return %c0_i32, %c0_i32_0 : i32, i32
  }
  func.func @transform_8(%arg0: i32) -> (i32, i32) {
    %c0_i32 = arith.constant 0 : i32
    %c0_i32_0 = arith.constant 0 : i32
    %c0_i32_1 = arith.constant 0 : i32
    return %c0_i32, %c0_i32_0 : i32, i32
  }
  func.func @transform_9(%arg0: i32) -> (i32, i32) {
    %c0_i32 = arith.constant 0 : i32
    %c0_i32_0 = arith.constant 0 : i32
    %c0_i32_1 = arith.constant 0 : i32
    return %c0_i32, %c0_i32_0 : i32, i32
  }
  func.func @transform_10(%arg0: i32) -> (i32, i32) {
    %c0_i32 = arith.constant 0 : i32
    %c0_i32_0 = arith.constant 0 : i32
    %c0_i32_1 = arith.constant 0 : i32
    return %c0_i32, %c0_i32_0 : i32, i32
  }
  func.func @transform_11(%arg0: i32) -> (i32, i32) {
    %c0_i32 = arith.constant 0 : i32
    %c0_i32_0 = arith.constant 0 : i32
    %c0_i32_1 = arith.constant 0 : i32
    return %c0_i32, %c0_i32_0 : i32, i32
  }
  func.func @transform_12(%arg0: i32) -> (i32, i32) {
    %c0_i32 = arith.constant 0 : i32
    %c0_i32_0 = arith.constant 0 : i32
    %c0_i32_1 = arith.constant 0 : i32
    return %c0_i32, %c0_i32_0 : i32, i32
  }
  func.func @transform_13(%arg0: i32) -> (i32, i32) {
    %c0_i32 = arith.constant 0 : i32
    %c0_i32_0 = arith.constant 0 : i32
    return %arg0, %c0_i32 : i32, i32
  }
}

</mosaic_0001>

<bundles_post_ra>
// kernel: tpu_custom_call.1
= control target key start
LH: loop header
LB: loop body
LE: loop exit
PB: predicated region body
PF: predicated region fallthrough
CT: control target
= control target key end

     0   :  { %18 = vsyncpa [#allocation3], 0  ;;  %s1049_s0 = inlined_call_operand.vmem [shape: f32[8,5], index: 0, kind: input, shape index: {}]   ;;  %s1050_s1 = inlined_call_operand.vmem [shape: f32[8,3], index: 1, kind: input, shape index: {}]   ;;  %s1051_s2 = inlined_call_operand.vmem [shape: f32[8,16], index: 2, kind: input, shape index: {}]   ;;  %s1052_s3 = inlined_call_operand.vmem [shape: f32[8,12], index: 3, kind: input, shape index: {}]   ;;  %s1053_s4 = inlined_call_operand.hbm [shape: bf16[5,128], index: 4, kind: input, shape index: {}]   ;;  %s1054_s5 = inlined_call_operand.hbm [shape: bf16[3,128], index: 5, kind: input, shape index: {}]   ;;  %s1055_s6 = inlined_call_operand.vmem [shape: bf16[16,128], index: 6, kind: input, shape index: {}]   ;;  %s1056_s7 = inlined_call_operand.hbm [shape: bf16[12,128], index: 7, kind: input, shape index: {}]   ;;  %s1057_s8 = inlined_call_operand.hbm [shape: f32[1,128], index: 8, kind: input, shape index: {}]   ;;  %s1058_s9 = inlined_call_operand.vmem [shape: bf16[128,128], index: 9, kind: input, shape index: {}]   ;;  %s1059_s10 = inlined_call_operand.hbm [shape: f32[1,128], index: 10, kind: input, shape index: {}]   ;;  %s1060_s11 = inlined_call_operand.vmem [shape: bf16[128,8], index: 11, kind: input, shape index: {}]   ;;  %s1061_s12 = inlined_call_operand.vmem [shape: f32[1,8], index: 12, kind: input, shape index: {}]   ;;  %s1062_s13 = inlined_call_operand.hbm [shape: f32[8,8], index: 13, kind: output, shape index: {}]  }
   0x1   :  { %19 = vsyncpa [#allocation6], 0 }
   0x2   :  { %20 = vsyncpa [#allocation9], 0 }
   0x3   :  { %21 = vsyncpa [#allocation4], 0  ;;  %s851_s25 = smov [#allocation5]   ;;  %s852_s27 = smov [#allocation8]  }
   0x4   :  { %s46_s26 = sshll.u32 %s851_s25, 4  ;;  %s70_s28 = sshll.u32 %s852_s27, 4  ;;  %s47_s26 = int_to_ptr.vmem [resolvable:$true] %s46_s26  ;;  %s71_s28 = int_to_ptr.vmem [resolvable:$true] %s70_s28 }
   0x5   :  { %s731_s29 = scalar_lea.vmem %s47_s26, 32  ;;  %p736_p1 = scmp.lt.s32.totalorder %s47_s26, %s47_s26 }
   0x6   :  { %p732_p0 = scmp.ne.s32.totalorder %s47_s26, %s731_s29  ;;  %p737_p2 = scmp.lt.s32.totalorder %s731_s29, %s731_s29 }
   0x8   :  { %p738_p3 = por %p737_p2, %p736_p1 }
   0xa   :  { %p739_p4 = pnand %p738_p3, %p732_p0 }
   0xc   :  { %742 = shalt.err (!%p739_p4)
}
   0xd   :  { %49 = dma.hbm_to_vmem [thread:$0]  %s1054_s5, 32, %s47_s26, [#allocation6]  }
   0xe   :  { %s751_s15 = scalar_lea.vmem %s71_s28, 16  ;;  %s755_s16 = scalar_lea.vmem %s71_s28, 32 }
   0xf   :  { %p752_p5 = scmp.ne.s32.totalorder %s71_s28, %s751_s15  ;;  %p756_p6 = scmp.lt.s32.totalorder %s71_s28, %s71_s28 }
  0x10   :  { %p757_p7 = scmp.lt.s32.totalorder %s755_s16, %s751_s15 }
  0x12   :  { %p758_p8 = por %p757_p7, %p756_p6 }
  0x14   :  { %p759_p9 = pnand %p758_p8, %p752_p5 }
  0x16   :  { %762 = shalt.err (!%p759_p9)
}
  0x17   :  { %73 = dma.hbm_to_vmem [thread:$0]  %s1057_s8, 16, %s71_s28, [#allocation9]  }
  0x18   :  { %s853_s19 = smov [#allocation2]   ;;  %s854_s21 = smov [#allocation7]  }
  0x19   :  { %s36_s20 = sshll.u32 %s853_s19, 4  ;;  %s57_s22 = sshll.u32 %s854_s21, 4  ;;  %s37_s20 = int_to_ptr.vmem [resolvable:$true] %s36_s20  ;;  %s58_s22 = int_to_ptr.vmem [resolvable:$true] %s57_s22 }
  0x1a   :  { %s771_s23 = scalar_lea.vmem %s37_s20, 64  ;;  %p776_p11 = scmp.lt.s32.totalorder %s37_s20, %s37_s20 }
  0x1b   :  { %p772_p10 = scmp.ne.s32.totalorder %s37_s20, %s771_s23  ;;  %p777_p12 = scmp.lt.s32.totalorder %s771_s23, %s771_s23 }
  0x1d   :  { %p778_p13 = por %p777_p12, %p776_p11 }
  0x1f   :  { %p779_p0 = pnand %p778_p13, %p772_p10 }
  0x21   :  { %782 = shalt.err (!%p779_p0)
}
  0x22   :  { %39 = dma.hbm_to_vmem [thread:$0]  %s1053_s4, 64, %s37_s20, [#allocation3]  }
  0x23   :  { %s791_s25 = scalar_lea.vmem %s58_s22, 128  ;;  %p796_p2 = scmp.lt.s32.totalorder %s58_s22, %s58_s22 }
  0x24   :  { %p792_p1 = scmp.ne.s32.totalorder %s58_s22, %s791_s25  ;;  %p797_p3 = scmp.lt.s32.totalorder %s791_s25, %s791_s25 }
  0x26   :  { %p798_p4 = por %p797_p3, %p796_p2 }
  0x28   :  { %p799_p5 = pnand %p798_p4, %p792_p1 }
  0x2a   :  { %802 = shalt.err (!%p799_p5)
}
  0x2b   :  { %s855_s8 = smov 64   ;;  %s856_s26 = smov 4  }
  0x2c   :  { %63 = dma.hbm_to_vmem [thread:$0]  %s1056_s7, 128, %s58_s22, [#allocation6], %s855_s8, %s855_s8, %s856_s26  }
  0x2d   :  { %s857_s29 = smov [#allocation10]  }
  0x2e   :  { %s82_s30 = sshll.u32 %s857_s29, 4  ;;  %s83_s30 = int_to_ptr.vmem [resolvable:$true] %s82_s30 }
  0x2f   :  { %s811_s14 = scalar_lea.vmem %s83_s30, 16  ;;  %s815_s15 = scalar_lea.vmem %s83_s30, 32 }
  0x30   :  { %p812_p6 = scmp.ne.s32.totalorder %s83_s30, %s811_s14  ;;  %p816_p7 = scmp.lt.s32.totalorder %s83_s30, %s83_s30 }
  0x31   :  { %p817_p8 = scmp.lt.s32.totalorder %s815_s15, %s811_s14 }
  0x33   :  { %p818_p9 = por %p817_p8, %p816_p7 }
  0x35   :  { %p819_p10 = pnand %p818_p9, %p812_p6 }
  0x37   :  { %822 = shalt.err (!%p819_p10)
}
  0x38   :  { %85 = dma.hbm_to_vmem [thread:$0]  %s1059_s10, 16, %s83_s30, [#allocation9]  }
  0x39   :  { %843 = dma.done.wait [#allocation3], 64  }
  0x3a   :  { %844 = vsyncadd [#allocation3], 4294967232 }
  0x3b   :  { %845 = dma.done.wait [#allocation6], 160  }
  0x3c   :  { %846 = vsyncadd [#allocation6], 4294967136 }
  0x3d   :  { %847 = dma.done.wait [#allocation9], 32  }
  0x3e   :  { %848 = vsyncadd [#allocation9], 4294967264  ;;  %vm116_vm0 = vcmask 1040384   ;;  %vm117_vm1 = vcmask 1041408   ;;  %v858_v0 = vmov 0.0   ;;  %v859_v1 = vmov 65535  }
  0x3f   :  { %630 = vmatprep.subr.bf16.mxu0 %v858_v0  ;;  %636 = vmatprep.subr.bf16.mxu1 %v858_v0  ;;  %v118_v2 = vsel %vm116_vm0, 4294967295, %v859_v1  ;;  %vm167_vm2 = vcmask 1042432   ;;  %v168_v3 = vsel %vm117_vm1, 4294967295, %v859_v1  ;;  %vm860_vm3 = vmmov 0   ;;  %v111_v6 = vld [vmem:[#allocation5] sm:$0x3] }
  0x40   :  { %632 = vmatprep.mubr.msk.bf16.mxu0 %vm860_vm3, %v858_v0  ;;  %638 = vmatprep.mubr.msk.bf16.mxu1 %vm860_vm3, %v858_v0  ;;  %v119_v4 = vsel %vm117_vm1, %v118_v2, 0  ;;  %v169_v5 = vsel %vm167_vm2, %v168_v3, 0  ;;  %v108_v7 = vld [vmem:[#allocation2] sm:$0x7]  ;;  %vm281_vm4 = vcmask 1045504   ;;  %vm112_vm5 = vcmask 23552  }
  0x41   :  { %v109_v8 = vld [vmem:[%s1050_s1] sm:$0xff]  ;;  %v121_v9 = vand.u32 %v119_v4, %v111_v6  ;;  %v171_v10 = vand.u32 %v169_v5, %v108_v7  ;;  %vm163_vm6 = vcmask 39936   ;;  %vm223_vm7 = vcmask 130048   ;;  %v707_v19 = vld [vmem:[%s1058_s9 + $0x38] sm:$0xff]   ;;  %v708_v22 = vld [vmem:[%s1058_s9 + $0x30] sm:$0xff]   ;;  %s861_s25 = smov [#allocation11]  }
  0x42   :  { %v106_v11 = vld [vmem:[%s1049_s0] sm:$0xff]  ;;  %v110_v12 = vpack.c.bf16 %v109_v8, %v109_v8  ;;  %vm277_vm8 = vcmask 97280   ;;  %v709_v23 = vld [vmem:[%s1058_s9 + $0x28] sm:$0xff]   ;;  %v711_v25 = vld [vmem:[%s1058_s9 + $0x18] sm:$0xff]   ;;  %s568_s8 = sshll.u32 %s861_s25, 4  ;;  %vm560_vm9 = vcmask 64512   ;;  %s569_s8 = int_to_ptr.vmem [resolvable:$true] %s568_s8 }
  0x43   :  { %v107_v13 = vpack.c.bf16 %v106_v11, %v106_v11  ;;  %631 = vmatpush3.bf16.msra.mxu0 %v121_v9  ;;  %637 = vmatpush3.bf16.msra.mxu1 %v171_v10  ;;  %v705_v14 = vld [vmem:[%s1055_s6] sm:$0xff]   ;;  %v712_v26 = vld [vmem:[%s1058_s9 + $0x10] sm:$0xff]   ;;  %v713_v27 = vld [vmem:[%s1058_s9 + $0x8] sm:$0xff]   ;;  %p828_p12 = scmp.lt.s32.totalorder %s569_s8, %s569_s8 }
  0x44   :  { %v706_v15 = vld [vmem:[#allocation7] sm:$0x3f]   ;;  %642 = vmatprep.subr.bf16.mxu0 %v858_v0  ;;  %648 = vmatprep.subr.bf16.mxu1 %v858_v0  ;;  %v715_v29 = vld [vmem:[%s1060_s11 + $0x38] sm:$0xff]   ;;  %v716_v30 = vld [vmem:[%s1060_s11 + $0x30] sm:$0xff]  }
  0x45   :  { %v283_v16 = vsel %vm281_vm4, %v706_v15, 0  ;;  %v213_v17 = vld [vmem:[%s1051_s2] sm:$0xff]  ;;  %v717_v31 = vld [vmem:[%s1060_s11 + $0x28] sm:$0xff]   ;;  %v719_v33 = vld [vmem:[%s1060_s11 + $0x18] sm:$0xff]  }
  0x46   :  { %633 = vmatmul.mubr.msk.bf16.vlgmr.msra.gmra.mxu0 %vm112_vm5, %v110_v12  ;;  %639 = vmatmul.mubr.msk.bf16.vlgmr.msra.gmra.mxu1 %vm163_vm6, %v107_v13  ;;  %v268_v18 = vld [vmem:[%s1052_s3] sm:$0xff]  ;;  %v214_v20 = vpack.c.bf16 %v213_v17, %v213_v17  ;;  %v720_v34 = vld [vmem:[%s1060_s11 + $0x10] sm:$0xff]   ;;  %v585_v47 = vld [vmem:[#allocation8] ss:$0 sm:$0xff] }
  0x47   :  { %643 = vmatpush3.bf16.msra.mxu0 %v705_v14  ;;  %649 = vmatpush3.bf16.msra.mxu1 %v283_v16  ;;  %v269_v21 = vpack.c.bf16 %v268_v18, %v268_v18  ;;  %v710_v24 = vld [vmem:[%s1058_s9 + $0x20] sm:$0xff]   ;;  %v721_v58 = vld [vmem:[%s1060_s11 + $0x8] sm:$0xff]   ;;  %v586_v60 = vld [vmem:[#allocation10] ss:$0 sm:$0xff] }
  0x48   :  { %644 = vmatprep.mubr.msk.bf16.mxu0 %vm860_vm3, %v858_v0  ;;  %650 = vmatprep.mubr.msk.bf16.mxu1 %vm860_vm3, %v858_v0  ;;  %v714_v28 = vld [vmem:[%s1058_s9] sm:$0xff]  }
  0x49   :  { %654 = vmatprep.subr.bf16.mxu0 %v858_v0  ;;  %674 = vmatprep.subr.bf16.mxu1 %v858_v0  ;;  %v718_v32 = vld [vmem:[%s1060_s11 + $0x20] sm:$0xff]  }
  0x4a   :  { %v722_v59 = vld [vmem:[%s1060_s11] sm:$0xff]   ;;  %s823_s11 = scalar_lea.vmem %s569_s8, 128 }
  0x4b   :  { %v595_v5 = vld [vmem:[%s1061_s12] ss:$0 sm:$0xff]  ;;  %p824_p11 = scmp.ne.s32.totalorder %s569_s8, %s823_s11  ;;  %p829_p13 = scmp.lt.s32.totalorder %s823_s11, %s823_s11 }
  0x4d   :  { %p830_p0 = por %p829_p13, %p828_p12 }
  0x4e   :  { %645 = vmatmul.mubr.msk.bf16.vlgmr.msra.gmra.mxu0 %vm223_vm7, %v214_v20  ;;  %651 = vmatmul.mubr.msk.bf16.vlgmr.msra.gmra.mxu1 %vm277_vm8, %v269_v21 }
  0x4f   :  { %655 = vmatpush3.bf16.msra.mxu0 %v707_v19  ;;  %670 = vmatprep.mubr.msk.bf16.mxu0 %vm860_vm3, %v858_v0  ;;  %p831_p1 = pnand %p830_p0, %p824_p11 }
  0x50   :  { %656 = vmatprep.subr.bf16.mxu0 %v858_v0  ;;  %690 = vmatprep.mubr.msk.bf16.mxu1 %vm860_vm3, %v858_v0 }
  0x51   :  { %675 = vmatpush3.bf16.msra.mxu1 %v715_v29 }
  0x52   :  { %676 = vmatprep.subr.bf16.mxu1 %v858_v0 }
  0x53   :  { %657 = vmatpush3.bf16.msra.mxu0 %v708_v22 }
  0x54   :  { %658 = vmatprep.subr.bf16.mxu0 %v858_v0 }
  0x55   :  { %677 = vmatpush3.bf16.msra.mxu1 %v716_v30 }
  0x56   :  { %678 = vmatprep.subr.bf16.mxu1 %v858_v0 }
  0x57   :  { %659 = vmatpush3.bf16.msra.mxu0 %v709_v23 }
  0x58   :  { %660 = vmatprep.subr.bf16.mxu0 %v858_v0 }
  0x59   :  { %679 = vmatpush3.bf16.msra.mxu1 %v717_v31 }
  0x5a   :  { %680 = vmatprep.subr.bf16.mxu1 %v858_v0 }
  0x5b   :  { %661 = vmatpush3.bf16.msra.mxu0 %v710_v24 }
  0x5c   :  { %662 = vmatprep.subr.bf16.mxu0 %v858_v0 }
  0x5d   :  { %681 = vmatpush3.bf16.msra.mxu1 %v718_v32 }
  0x5e   :  { %682 = vmatprep.subr.bf16.mxu1 %v858_v0 }
  0x5f   :  { %663 = vmatpush3.bf16.msra.mxu0 %v711_v25 }
  0x60   :  { %664 = vmatprep.subr.bf16.mxu0 %v858_v0 }
  0x61   :  { %683 = vmatpush3.bf16.msra.mxu1 %v719_v33 }
  0x62   :  { %684 = vmatprep.subr.bf16.mxu1 %v858_v0 }
  0x63   :  { %665 = vmatpush3.bf16.msra.mxu0 %v712_v26 }
  0x64   :  { %666 = vmatprep.subr.bf16.mxu0 %v858_v0 }
  0x65   :  { %685 = vmatpush3.bf16.msra.mxu1 %v720_v34 }
  0x66   :  { %686 = vmatprep.subr.bf16.mxu1 %v858_v0 }
  0x67   :  { %667 = vmatpush3.bf16.msra.mxu0 %v713_v27 }
  0x68   :  { %668 = vmatprep.subr.bf16.mxu0 %v858_v0 }
  0x69   :  { %687 = vmatpush3.bf16.msra.mxu1 %v721_v58 }
  0x6a   :  { %688 = vmatprep.subr.bf16.mxu1 %v858_v0 }
  0x6b   :  { %669 = vmatpush3.bf16.msra.mxu0 %v714_v28 }
  0x6d   :  { %689 = vmatpush3.bf16.msra.mxu1 %v722_v59 }
 0x106   :  { %v157_v35 = vpop.f32.mrf.mxu0  ;;  %v207_v36 = vpop.f32.mrf.mxu1 }
 0x107   :  { %v208_v43 = vadd.f32 %v207_v36, %v157_v35 }
 0x108   :  { %v634_v37 = vpop.f32.mrf.mxu0  ;;  %v640_v38 = vpop.f32.mrf.mxu1 }
 0x10a   :  { %v160_v39 = vpop.f32.mrf.mxu0  ;;  %v210_v40 = vpop.f32.mrf.mxu1 }
 0x10c   :  { %v635_v41 = vpop.f32.mrf.mxu0  ;;  %v641_v42 = vpop.f32.mrf.mxu1 }
 0x10e   :  { %v261_v44 = vpop.f32.mrf.mxu0  ;;  %v319_v45 = vpop.f32.mrf.mxu1 }
 0x10f   :  { %v267_v46 = vadd.f32 %v261_v44, %v208_v43 }
 0x110   :  { %v646_v48 = vpop.f32.mrf.mxu0  ;;  %v652_v49 = vpop.f32.mrf.mxu1 }
 0x111   :  { %v325_v50 = vadd.f32 %v319_v45, %v267_v46 }
 0x112   :  { %v264_v51 = vpop.f32.mrf.mxu0  ;;  %v322_v52 = vpop.f32.mrf.mxu1 }
 0x113   :  { %v333_v53 = vadd.f32 %v585_v47, %v325_v50 }
 0x114   :  { %v647_v54 = vpop.f32.mrf.mxu0  ;;  %v653_v55 = vpop.f32.mrf.mxu1 }
 0x115   :  { %v334_v56 = vmax.f32 %v333_v53, 0.0 }
 0x117   :  { %v335_v57 = vpack.c.bf16 %v334_v56, %v334_v56 }
 0x119   :  { %671 = vmatmul.mubr.bf16.vlgmr.msra.gmra.mxu0 %v335_v57 }
 0x1d9   :  { %v441_v61 = vpop.f32.mrf.mxu0 }
 0x1da   :  { %v442_v62 = vadd.f32 %v586_v60, %v441_v61 }
 0x1db   :  { %v672_v63 = vpop.f32.mrf.mxu0 }
 0x1dc   :  { %v447_v1 = vmax.f32 %v442_v62, 0.0 }
 0x1dd   :  { %v444_v2 = vpop.f32.mrf.mxu0 }
 0x1de   :  { %v448_v3 = vpack.c.bf16 %v447_v1, %v447_v1 }
 0x1df   :  { %v673_v4 = vpop.f32.mrf.mxu0 }
 0x1e0   :  { %691 = vmatmul.mubr.bf16.vlgmr.msra.gmra.mxu1 %v448_v3 }
 0x2a0   :  { %v554_v0 = vpop.f32.mrf.mxu1 }
 0x2a1   :  { %v555_v6 = vadd.f32 %v595_v5, %v554_v0 }
 0x2a2   :  { %v692_v7 = vpop.f32.mrf.mxu1 }
 0x2a3   :  { %561 = vst.msk [vmem:[#allocation11] sm:$0xff] %vm560_vm9, %v555_v6 }
 0x2a4   :  { %v557_v8 = vpop.f32.mrf.mxu1 }
 0x2a5   :  { %834 = shalt.err (!%p831_p1)
}
 0x2a6   :  { %571 = dma.vmem_to_hbm [thread:$0]  %s569_s8, 128, %s1062_s13, [#allocation4]   ;;  %v693_v9 = vpop.f32.mrf.mxu1 }
 0x2a7   :  { %849 = dma.done.wait [#allocation4], 128  }
 0x2a8   :  { %850 = vsyncadd [#allocation4], 4294967168 }
 0x2a9   :  { %575 = vsyncpa [#allocation3], 1 }
 0x2aa   :  { %576 = vsyncpa [#allocation6], 1 }
 0x2ab   :  { %577 = vsyncpa [#allocation9], 1 }
 0x2ac   :  { %578 = vsyncpa [#allocation4], 1 }

</bundles_post_ra>
